<compile_context>
chip_gen: v6e
topology: v6e:2x2x1
jax: 0.10.0
libtpu: 0.0.40
codegen_flags: <defaults>
</compile_context>

<pallas_src>
import jax
import jax.numpy as jnp
from jax.experimental import pallas as pl
from jax.experimental.pallas import tpu as pltpu


def _round_up(x, m):
    return ((x + m - 1) // m) * m


# ----------------------------------------------------------------------------
# Kernel: transposed 2-layer MLP.  Weights/biases are VMEM-resident
# (constant index maps); x^T / out^T are streamed in batch tiles.
# ----------------------------------------------------------------------------
def bfn_forward_kernel(xt_ref, w1t_ref, b1t_ref, w2t_ref, b2t_ref, out_ref):
    # Layer 1 (transposed): h^T = W1'^T @ x^T -> (H, TB), f32 accumulation.
    h = jnp.dot(w1t_ref[...], xt_ref[...], preferred_element_type=jnp.float32)
    h = jnp.maximum(h + b1t_ref[...], 0.0)            # f32 VPU epilogue (v5e-safe)

    # Layer 2 (transposed): out^T = W2^T @ h^T -> (d_out, TB), lane-dense store.
    out = jnp.dot(w2t_ref[...], h.astype(jnp.bfloat16),
                  preferred_element_type=jnp.float32)
    out_ref[...] = out + b2t_ref[...]


# ----------------------------------------------------------------------------
# One-time parameter preparation (hoisted out of the hot path).
# ----------------------------------------------------------------------------
def prepare_params(params):
    """Fold theta*2-1 into W1, stack the time row, transpose, pad, cast."""
    w1_theta, w1_time, b1, w2, b2 = params
    dk, hidden = w1_theta.shape
    d_out = w2.shape[1]
    f_in = dk + 1
    f_pad = _round_up(f_in, 8)                       # sublane-align x^T rows

    # theta*2-1 absorbed:  W1' = 2*W1_theta (plus time row), b1' = b1 - colsum.
    w1 = jnp.concatenate([2.0 * w1_theta, w1_time], axis=0)          # (F, H)
    b1_folded = b1 - jnp.sum(w1_theta, axis=0, keepdims=True)        # (1, H)

    w1t = jnp.zeros((hidden, f_pad), jnp.float32).at[:, :f_in].set(w1.T)
    return {
        "w1t": w1t.astype(jnp.bfloat16),             # (H, Fp)  resident
        "b1t": b1_folded.T,                          # (H, 1)   f32
        "w2t": w2.T.astype(jnp.bfloat16),            # (d_out, H) resident
        "b2t": b2.T,                                 # (d_out, 1) f32
        "dk": dk, "hidden": hidden, "d_out": d_out, "f_pad": f_pad,
    }


def _choose_batch_tiling(batch, block_b):
    """Return (padded batch, batch tile).  block_b must be a multiple of 128."""
    if batch > block_b:
        return _round_up(batch, block_b), block_b
    if batch > 512:
        # Two 128-aligned steps so the "parallel" axis shards across both
        # TensorCores on v7x.
        tb = _round_up((batch + 1) // 2, 128)
        return 2 * tb, tb
    bp = _round_up(batch, 8)
    return bp, bp                                    # single step, full dim


# ----------------------------------------------------------------------------
# Hot path.
# ----------------------------------------------------------------------------
def bfn_forward(theta, t, prep, *, block_b=1024):
    """theta: (B, D, K) float32, t: (B, 1) float32 -> (B, d_out) float32."""
    B = theta.shape[0]
    dk, hidden, d_out, f_pad = (prep["dk"], prep["hidden"],
                                prep["d_out"], prep["f_pad"])
    f_in = dk + 1
    Bp, TB = _choose_batch_tiling(B, block_b)

    # Build x = [theta.view(B,-1), t] and lay it out transposed / padded / bf16.
    theta_flat = theta.reshape(B, -1).astype(jnp.float32)            # (B, D*K)
    x = jnp.concatenate([theta_flat, t.astype(jnp.float32)], axis=-1)  # (B, F)
    xt = jnp.zeros((f_pad, Bp), jnp.bfloat16).at[:f_in, :B].set(
        x.T.astype(jnp.bfloat16))                                     # (Fp, Bp)

    flops = 2 * Bp * (f_pad * hidden + hidden * d_out)
    bytes_accessed = (xt.size * 2                       # x^T read (bf16)
                      + prep["w1t"].size * 2 + prep["w2t"].size * 2
                      + (hidden + d_out) * 4            # biases
                      + d_out * Bp * 4)                 # out^T write (f32)

    out_t = pl.pallas_call(
        bfn_forward_kernel,
        out_shape=jax.ShapeDtypeStruct((d_out, Bp), jnp.float32),
        grid=(Bp // TB,),
        in_specs=[
            pl.BlockSpec((f_pad, TB), lambda i: (0, i)),      # x^T, streamed
            pl.BlockSpec((hidden, f_pad), lambda i: (0, 0)),  # W1'^T, resident
            pl.BlockSpec((hidden, 1), lambda i: (0, 0)),      # b1'^T, resident
            pl.BlockSpec((d_out, hidden), lambda i: (0, 0)),  # W2^T,  resident
            pl.BlockSpec((d_out, 1), lambda i: (0, 0)),       # b2^T,  resident
        ],
        out_specs=pl.BlockSpec((d_out, TB), lambda i: (0, i)),
        compiler_params=pltpu.CompilerParams(
            dimension_semantics=("parallel",)),
        cost_estimate=pl.CostEstimate(
            flops=flops, transcendentals=0, bytes_accessed=bytes_accessed),
    )(xt, prep["w1t"], prep["b1t"], prep["w2t"], prep["b2t"])

    return out_t[:, :B].T                                             # (B, d_out)


# ----------------------------------------------------------------------------
# Deterministic init + pure-JAX reference.
# ----------------------------------------------------------------------------
def init_params(key, in_theta, hidden, d_out):
    """Deterministic MLP init (uniform +-1/sqrt(fan_in), like nn.Linear)."""
    k1, k2, k3, k4 = jax.random.split(key, 4)
    fan1 = in_theta + 1
    lim1 = 1.0 / jnp.sqrt(fan1)
    w1_full = jax.random.uniform(k1, (fan1, hidden), jnp.float32, -lim1, lim1)
    w1_theta = w1_full[:in_theta]                                     # (D*K, H)
    w1_time = w1_full[in_theta:]                                      # (1, H)
    b1 = jax.random.uniform(k2, (1, hidden), jnp.float32, -lim1, lim1)
    lim2 = 1.0 / jnp.sqrt(hidden)
    w2 = jax.random.uniform(k3, (hidden, d_out), jnp.float32, -lim2, lim2)
    b2 = jax.random.uniform(k4, (1, d_out), jnp.float32, -lim2, lim2)
    return (w1_theta, w1_time, b1, w2, b2)


def bfn_forward_ref(theta, t, params):
    """Pure-JAX f32 reference mirroring the PyTorch forward."""
    B = theta.shape[0]
    w1_theta, w1_time, b1, w2, b2 = params
    w1_full = jnp.concatenate([w1_theta, w1_time], axis=0)
    x = theta * 2.0 - 1.0
    x = x.reshape(B, -1)
    inp = jnp.concatenate([x, t], axis=-1)
    h = jnp.maximum(inp @ w1_full + b1, 0.0)
    return h @ w2 + b2


# TODO(synk): loss/sampling methods (sender-distribution sampling, Bayesian
# updates, categorical sampling loop) are host-side RNG-driven control flow,
# not part of forward(); only the forward pass is implemented as a kernel.

if __name__ == "__main__":
    # Small shapes implied by the module: k=2 classes, d=2 positions.
    B, D, K, H = 8, 2, 2, 32
    D_OUT = D  # one logit per position (k==2 sigmoid path)

    key = jax.random.PRNGKey(0)
    k_theta, k_t, k_params = jax.random.split(key, 3)

    # theta are probabilities in [0, 1] (as produced by bayesian_update_of_theta)
    theta = jax.random.uniform(k_theta, (B, D, K), jnp.float32)
    t = jax.random.uniform(k_t, (B, 1), jnp.float32)
    params = init_params(k_params, D * K, H, D_OUT)

    prep = prepare_params(params)          # one-time weight folding / casts
    out = bfn_forward(theta, t, prep)
    out = jax.block_until_ready(out)

    ref = bfn_forward_ref(theta, t, params)
    assert out.shape == (B, D_OUT)
    # bf16 MXU inputs -> loosened tolerance vs the f32 reference.
    assert jnp.allclose(out, ref, atol=3e-2, rtol=3e-2), "mismatch vs reference"

    print("KERNEL_OK")
</pallas_src>

<mosaic_0001>
module attributes {stable_mosaic.version = 11 : i64} {
  func.func @bfn_forward_kernel(%arg0: i32, %arg1: memref<8x8xbf16, #tpu.memory_space<vmem>>, %arg2: memref<32x8xbf16, #tpu.memory_space<vmem>>, %arg3: memref<32x1xf32, #tpu.memory_space<vmem>>, %arg4: memref<2x32xbf16, #tpu.memory_space<vmem>>, %arg5: memref<2x1xf32, #tpu.memory_space<vmem>>, %arg6: memref<2x8xf32, #tpu.memory_space<vmem>>) attributes {dimension_semantics = [#tpu.dimension_semantics<parallel>], iteration_bounds = array<i64: 1>, scalar_prefetch = 0 : i64, scratch_operands = 0 : i64, tpu.core_type = #tpu.core_type<tc>, window_params = [{transform_indices = @transform_0, window_bounds = array<i64: 8, 8>}, {pipeline_mode = #tpu.pipeline_mode<synchronous>, transform_indices = @transform_1, window_bounds = array<i64: 32, 8>}, {pipeline_mode = #tpu.pipeline_mode<synchronous>, transform_indices = @transform_2, window_bounds = array<i64: 32, 1>}, {pipeline_mode = #tpu.pipeline_mode<synchronous>, transform_indices = @transform_3, window_bounds = array<i64: 2, 32>}, {pipeline_mode = #tpu.pipeline_mode<synchronous>, transform_indices = @transform_4, window_bounds = array<i64: 2, 1>}, {transform_indices = @transform_5, window_bounds = array<i64: 2, 8>}]} {
    %c0 = arith.constant 0 : index
    %c0_0 = arith.constant 0 : index
    %0 = vector.load %arg2[%c0, %c0_0] : memref<32x8xbf16, #tpu.memory_space<vmem>>, vector<32x8xbf16>
    %c0_1 = arith.constant 0 : index
    %c0_2 = arith.constant 0 : index
    %1 = vector.load %arg1[%c0_1, %c0_2] : memref<8x8xbf16, #tpu.memory_space<vmem>>, vector<8x8xbf16>
    %cst = arith.constant dense<0.000000e+00> : vector<32x8xf32>
    %2 = tpu.matmul %0, %1, %cst {dimension_numbers = #tpu.dot_dimension_numbers<[1], [0], [0], [1], [0, 0, 1, 1], [], []>} : vector<32x8xbf16>, vector<8x8xbf16>, vector<32x8xf32> -> vector<32x8xf32>
    %c0_3 = arith.constant 0 : index
    %c0_4 = arith.constant 0 : index
    %3 = vector.load %arg3[%c0_3, %c0_4] : memref<32x1xf32, #tpu.memory_space<vmem>>, vector<32x1xf32>
    %4 = vector.broadcast %3 : vector<32x1xf32> to vector<32x8xf32>
    %5 = arith.addf %2, %4 : vector<32x8xf32>
    %cst_5 = arith.constant 0.000000e+00 : f32
    %6 = vector.broadcast %cst_5 : f32 to vector<32x8xf32>
    %7 = arith.maximumf %5, %6 : vector<32x8xf32>
    %c0_6 = arith.constant 0 : index
    %c0_7 = arith.constant 0 : index
    %8 = vector.load %arg4[%c0_6, %c0_7] : memref<2x32xbf16, #tpu.memory_space<vmem>>, vector<2x32xbf16>
    %9 = arith.truncf %7 : vector<32x8xf32> to vector<32x8xbf16>
    %cst_8 = arith.constant dense<0.000000e+00> : vector<2x8xf32>
    %10 = tpu.matmul %8, %9, %cst_8 {dimension_numbers = #tpu.dot_dimension_numbers<[1], [0], [0], [1], [0, 0, 1, 1], [], []>} : vector<2x32xbf16>, vector<32x8xbf16>, vector<2x8xf32> -> vector<2x8xf32>
    %c0_9 = arith.constant 0 : index
    %c0_10 = arith.constant 0 : index
    %11 = vector.load %arg5[%c0_9, %c0_10] : memref<2x1xf32, #tpu.memory_space<vmem>>, vector<2x1xf32>
    %12 = vector.broadcast %11 : vector<2x1xf32> to vector<2x8xf32>
    %13 = arith.addf %10, %12 : vector<2x8xf32>
    %c0_11 = arith.constant 0 : index
    %c0_12 = arith.constant 0 : index
    %14 = vector.load %arg6[%c0_11, %c0_12] : memref<2x8xf32, #tpu.memory_space<vmem>>, vector<2x8xf32>
    tpu.vector_store %arg6[%c0_11, %c0_12], %13 {strides = array<i32>} : memref<2x8xf32, #tpu.memory_space<vmem>>, vector<2x8xf32>,
    return
  }
  func.func @transform_0(%arg0: i32) -> (i32, i32) {
    %c0_i32 = arith.constant 0 : i32
    %c0_i32_0 = arith.constant 0 : i32
    return %c0_i32, %arg0 : i32, i32
  }
  func.func @transform_1(%arg0: i32) -> (i32, i32) {
    %c0_i32 = arith.constant 0 : i32
    %c0_i32_0 = arith.constant 0 : i32
    %c0_i32_1 = arith.constant 0 : i32
    return %c0_i32, %c0_i32_0 : i32, i32
  }
  func.func @transform_2(%arg0: i32) -> (i32, i32) {
    %c0_i32 = arith.constant 0 : i32
    %c0_i32_0 = arith.constant 0 : i32
    %c0_i32_1 = arith.constant 0 : i32
    return %c0_i32, %c0_i32_0 : i32, i32
  }
  func.func @transform_3(%arg0: i32) -> (i32, i32) {
    %c0_i32 = arith.constant 0 : i32
    %c0_i32_0 = arith.constant 0 : i32
    %c0_i32_1 = arith.constant 0 : i32
    return %c0_i32, %c0_i32_0 : i32, i32
  }
  func.func @transform_4(%arg0: i32) -> (i32, i32) {
    %c0_i32 = arith.constant 0 : i32
    %c0_i32_0 = arith.constant 0 : i32
    %c0_i32_1 = arith.constant 0 : i32
    return %c0_i32, %c0_i32_0 : i32, i32
  }
  func.func @transform_5(%arg0: i32) -> (i32, i32) {
    %c0_i32 = arith.constant 0 : i32
    %c0_i32_0 = arith.constant 0 : i32
    return %c0_i32, %arg0 : i32, i32
  }
}

</mosaic_0001>

<bundles_post_ra>
// kernel: tpu_custom_call.1
= control target key start
LH: loop header
LB: loop body
LE: loop exit
PB: predicated region body
PF: predicated region fallthrough
CT: control target
= control target key end

     0   :  { %vm68_vm0 = vcmask 1043456   ;;  %vm61_vm1 = vcmask 64512   ;;  %v250_v5 = vmov 0   ;;  %s314_s0 = inlined_call_operand.vmem [shape: bf16[8,8], index: 0, kind: input, shape index: {}]   ;;  %s315_s1 = inlined_call_operand.vmem [shape: bf16[32,8], index: 1, kind: input, shape index: {}]   ;;  %s316_s2 = inlined_call_operand.vmem [shape: f32[32,1], index: 2, kind: input, shape index: {}]   ;;  %s317_s3 = inlined_call_operand.vmem [shape: bf16[2,32], index: 3, kind: input, shape index: {}]   ;;  %s318_s4 = inlined_call_operand.vmem [shape: f32[2,1], index: 4, kind: input, shape index: {}]   ;;  %s319_s5 = inlined_call_operand.hbm [shape: f32[2,8], index: 5, kind: output, shape index: {}]  }
   0x1   :  { %v26_v0 = vld [vmem:[%s314_s0] sm:$0xf]  ;;  %v227_v3 = vld [vmem:[%s315_s1 + $0x8] sm:$0xff]   ;;  %v29_v4 = vld [vmem:[%s316_s2 + $0x10] sm:$0xff]  ;;  %224 = vset.pattern.permute.xlu0 %v250_v5  ;;  %225 = vset.pattern.permute.xlu1 %v250_v5 }
   0x2   :  { %v226_v1 = vld [vmem:[%s315_s1] sm:$0xff]   ;;  %219 = vmatprep.subr.msk.bf16.mxu0 %vm68_vm0, %v26_v0  ;;  %v70_v2 = vsel %vm68_vm0, %v26_v0, 0  ;;  %43 = vperm.xlu0 %224, %v29_v4  }
   0x3   :  { %206 = vmatpush3.bf16.msra.mxu0 %v70_v2  ;;  %207 = vmatprep.mubr.msk.bf16.mxu0 %vm61_vm1, %v226_v1  ;;  %v27_v6 = vld [vmem:[%s316_s2] sm:$0xff] }
   0x4   :  { %33 = vperm.xlu1 %225, %v27_v6  }
   0x5   :  { %10 = vsyncpa [#allocation3], 0  ;;  %v30_v7 = vld [vmem:[%s316_s2 + $0x18] sm:$0xff]  ;;  %v28_v8 = vld [vmem:[%s316_s2 + $0x8] sm:$0xff]  ;;  %v251_v10 = vmov 0.0   ;;  %vm252_vm2 = vmmov 0  }
   0x6   :  { %208 = vmatmul.mubr.msk.bf16.vlgmr.msra.gmra.mxu0 %vm61_vm1, %v227_v3  ;;  %48 = vperm.xlu0 %224, %v30_v7   ;;  %v128_v9 = vld [vmem:[%s318_s4] sm:$0x3]  ;;  %vm134_vm3 = vcmask 261120   ;;  %s253_s7 = smov [#allocation2]   ;;  %vm178_vm4 = vcmask 58368  }
   0x7   :  { %211 = vmatprep.subr.bf16.mxu1 %v251_v10  ;;  %215 = vmatprep.mubr.msk.bf16.mxu1 %vm252_vm2, %v251_v10  ;;  %v125_v29 = vld [vmem:[%s317_s3] sm:$0x1]  ;;  %s186_s8 = sshll.u32 %s253_s7, 4  ;;  %s187_s8 = int_to_ptr.vmem [resolvable:$true] %s186_s8 }
   0x8   :  { %38 = vperm.xlu1 %225, %v28_v8   ;;  %s228_s9 = scalar_lea.vmem %s187_s8, 32  ;;  %p233_p1 = scmp.lt.s32.totalorder %s187_s8, %s187_s8 }
   0x9   :  { %p229_p0 = scmp.ne.s32.totalorder %s187_s8, %s228_s9  ;;  %p234_p2 = scmp.lt.s32.totalorder %s228_s9, %s228_s9 }
   0xa   :  { %131 = vperm.xlu0 %224, %v128_v9  }
   0xb   :  { %p235_p3 = por %p234_p2, %p233_p1 }
   0xd   :  { %p236_p4 = pnand %p235_p3, %p229_p0 }
  0x7d   :  { %v44_v11 = vpop.permute.xlu0 %43 }
  0x7f   :  { %v34_v12 = vpop.permute.xlu1 %33 }
  0x81   :  { %v49_v16 = vpop.permute.xlu0 %48 }
  0x83   :  { %v39_v19 = vpop.permute.xlu1 %38 }
  0x85   :  { %v132_v30 = vpop.permute.xlu0 %131 }
  0xc6   :  { %v209_v13 = vpop.f32.mrf.mxu0 }
  0xc7   :  { %v115_v15 = vadd.f32 %v209_v13, %v44_v11 }
  0xc8   :  { %v106_v14 = vpop.f32.mrf.mxu0 }
  0xc9   :  { %v123_v21 = vmax.f32 %v115_v15, 0.0  ;;  %v107_v22 = vadd.f32 %v106_v14, %v34_v12 }
  0xca   :  { %v210_v17 = vpop.f32.mrf.mxu0 }
  0xcb   :  { %v118_v18 = vadd.f32 %v210_v17, %v49_v16  ;;  %v121_v27 = vmax.f32 %v107_v22, 0.0 }
  0xcc   :  { %v109_v20 = vpop.f32.mrf.mxu0 }
  0xcd   :  { %v124_v23 = vmax.f32 %v118_v18, 0.0  ;;  %v110_v24 = vadd.f32 %v109_v20, %v39_v19 }
  0xcf   :  { %v122_v25 = vmax.f32 %v110_v24, 0.0  ;;  %v127_v26 = vpack.c.bf16 %v124_v23, %v123_v21 }
  0xd1   :  { %212 = vmatpush3.bf16.msra.mxu1 %v127_v26  ;;  %v126_v28 = vpack.c.bf16 %v122_v25, %v121_v27 }
  0xd2   :  { %213 = vmatprep.subr.bf16.mxu1 %v251_v10 }
  0xd5   :  { %214 = vmatpush3.bf16.msra.mxu1 %v126_v28 }
  0xd8   :  { %216 = vmatmul.mubr.msk.bf16.vlgmr.msra.gmra.mxu1 %vm134_vm3, %v125_v29 }
 0x198   :  { %v172_v31 = vpop.f32.mrf.mxu1 }
 0x199   :  { %v173_v32 = vadd.f32 %v172_v31, %v132_v30 }
 0x19a   :  { %v217_v33 = vpop.f32.mrf.mxu1 }
 0x19b   :  { %179 = vst.msk [vmem:[#allocation2] sm:$0x3] %vm178_vm4, %v173_v32 }
 0x19c   :  { %v175_v34 = vpop.f32.mrf.mxu1 }
 0x19d   :  { %239 = shalt.err (!%p236_p4)
}
 0x19e   :  { %189 = dma.vmem_to_hbm [thread:$0]  %s187_s8, 32, %s319_s5, [#allocation3]   ;;  %v218_v35 = vpop.f32.mrf.mxu1 }
 0x19f   :  { %248 = dma.done.wait [#allocation3], 32  }
 0x1a0   :  { %249 = vsyncadd [#allocation3], 4294967264 }
 0x1a1   :  { %193 = vsyncpa [#allocation3], 1 }

</bundles_post_ra>
